<compile_context>
chip_gen: v6e
topology: v6e:2x2x1
jax: 0.10.0
libtpu: 0.0.40
codegen_flags: <defaults>
</compile_context>

<pallas_src>
import jax
import jax.numpy as jnp
from jax.experimental import pallas as pl
from jax.experimental.pallas import tpu as pltpu

BN_EPS = 1e-5
LANE = 128


def _pad_to(n, m=LANE):
    return ((n + m - 1) // m) * m


# ----------------------------- fused Pallas kernel -------------------------- #

def _bn_train(x, gamma, beta):
    # Training-mode BatchNorm1d: biased batch statistics + affine transform (all f32 on the VPU).
    mean = jnp.mean(x, axis=0, keepdims=True)                  # (1, F)
    var = jnp.mean((x - mean) ** 2, axis=0, keepdims=True)     # (1, F) biased var
    inv = jax.lax.rsqrt(var + BN_EPS)
    return (x - mean) * inv * gamma + beta


def _fgn(x, wc, c_sq_scaled, nis):
    # Finite Gaussian Neuron layer with the W / C matmuls fused into one MXU call.
    #   wc = [W^T | (-2/sigma^2) C^T]   (In_pad, 2*Out_pad), bf16
    #   gaussian arg = nis*||x||^2 + (-||C||^2/sigma^2) + x @ ((-2/sigma^2) C^T)   (<= 0)
    out_pad = wc.shape[1] // 2
    lx = jnp.dot(x.astype(jnp.bfloat16), wc,
                 preferred_element_type=jnp.float32)           # (B, 2*Out_pad), f32 acc
    l = lx[:, :out_pad]                                        # linear part
    xc_scaled = lx[:, out_pad:]                                # scaled cross term
    x_sq = jnp.sum(x * x, axis=1, keepdims=True)               # (B, 1) f32
    arg = jnp.minimum(x_sq * nis + c_sq_scaled + xc_scaled, 0.0)
    return l * jnp.exp(arg)                                    # exp on the EUP


def make_fused_forward_kernel(n_hidden):
    """Kernel body for: input-BN -> [FGN -> BN] * n_hidden -> FGN.

    Ref layout (all VMEM, full-array blocks):
      refs[0]            : x                (B, in_pad)  f32
      refs[1]            : input-BN params  (2, in_pad)  f32   rows = [gamma, beta]
      per hidden layer   : wc  (In_pad, 2*Out_pad) bf16
                           vec (4, Out_pad) f32   rows = [c_sq_scaled, nis, bn_gamma, bn_beta]
      final layer        : wc  (In_pad, 2*Out_pad) bf16
                           vec (2, Out_pad) f32   rows = [c_sq_scaled, nis]
      refs[-1]           : output           (B, out_pad) f32
    """

    def kernel(*refs):
        x_ref = refs[0]
        out_ref = refs[-1]

        ib = refs[1][...]
        x = _bn_train(x_ref[...], ib[0:1, :], ib[1:2, :])

        idx = 2
        for _ in range(n_hidden):
            wc_ref = refs[idx]
            vec = refs[idx + 1][...]
            idx += 2
            x = _fgn(x, wc_ref[...], vec[0:1, :], vec[1:2, :])
            x = _bn_train(x, vec[2:3, :], vec[3:4, :])

        wc_ref = refs[idx]
        vec = refs[idx + 1][...]
        out_ref[...] = _fgn(x, wc_ref[...], vec[0:1, :], vec[1:2, :])

    return kernel


def _vmem_spec():
    return pl.BlockSpec(memory_space=pltpu.MemorySpace.VMEM)


# ------------------------------ the network -------------------------------- #

class FeedforwardFGNNet:
    def __init__(self, in_feats, out_feats, hidden_l_nums, drop_p=0.0, seed=0):
        assert drop_p == 0.0, "dropout path not exercised (drop_p=0.0 default)"
        self.in_feats = in_feats
        self.out_feats = out_feats
        self.hidden_l_nums = list(hidden_l_nums)

        self.in_pad = _pad_to(in_feats)
        self.out_pad = _pad_to(out_feats)
        hidden_pads = [_pad_to(h) for h in self.hidden_l_nums]

        key = jax.random.PRNGKey(seed)

        # input BatchNorm1d(in_feats): gamma=1, beta=0 (PyTorch default init); padded cols zeroed.
        ib_gamma = jnp.zeros((self.in_pad,), jnp.float32).at[:in_feats].set(1.0)
        ib_beta = jnp.zeros((self.in_pad,), jnp.float32)
        self.ib_vec = jnp.stack([ib_gamma, ib_beta], axis=0)          # (2, in_pad)

        self.hidden = []
        next_in, next_in_pad = in_feats, self.in_pad
        for next_out, next_out_pad in zip(self.hidden_l_nums, hidden_pads):
            key, kw, kc = jax.random.split(key, 3)
            wc, c_sq_scaled, nis_row = self._init_fgn(kw, kc, next_in, next_out,
                                                      next_in_pad, next_out_pad)
            bn_gamma = jnp.zeros((next_out_pad,), jnp.float32).at[:next_out].set(1.0)
            bn_beta = jnp.zeros((next_out_pad,), jnp.float32)
            vec = jnp.stack([c_sq_scaled, nis_row, bn_gamma, bn_beta], axis=0)  # (4, out_pad)
            self.hidden.append((wc, vec))
            next_in, next_in_pad = next_out, next_out_pad

        key, kw, kc = jax.random.split(key, 3)
        wc, c_sq_scaled, nis_row = self._init_fgn(kw, kc, next_in, out_feats,
                                                  next_in_pad, self.out_pad)
        self.fl = (wc, jnp.stack([c_sq_scaled, nis_row], axis=0))      # (2, out_pad)

        self._build_fused_call()

    @staticmethod
    def _init_fgn(kw, kc, fan_in, fan_out, in_pad, out_pad):
        """Returns (wc, c_sq_scaled, nis_row) with the W / scaled-C matmuls pre-fused.

        wc           : (in_pad, 2*out_pad) bf16  = [W^T | (-2/sigma^2) C^T]   zero padded
        c_sq_scaled  : (out_pad,) f32            = -||C||^2 / sigma^2         zero padded
        nis_row      : (out_pad,) f32            = -1 / sigma^2               zero padded
        """
        bound = 1.0 / float(fan_in) ** 0.5
        w = jax.random.uniform(kw, (fan_out, fan_in), jnp.float32, -bound, bound)
        c = 0.1 * jax.random.normal(kc, (fan_out, fan_in), jnp.float32)
        sig_sq = 4.0 * float(fan_in)                                   # sigma = 2*sqrt(fan_in)
        nis = -1.0 / sig_sq

        w_t = jnp.zeros((in_pad, out_pad), jnp.float32).at[:fan_in, :fan_out].set(w.T)
        c_t_scaled = jnp.zeros((in_pad, out_pad), jnp.float32).at[:fan_in, :fan_out].set(
            (-2.0 * nis) * c.T)
        wc = jnp.concatenate([w_t, c_t_scaled], axis=1).astype(jnp.bfloat16)

        c_sq_scaled = jnp.zeros((out_pad,), jnp.float32).at[:fan_out].set(
            nis * jnp.sum(c * c, axis=1))
        nis_row = jnp.zeros((out_pad,), jnp.float32).at[:fan_out].set(nis)
        return wc, c_sq_scaled, nis_row

    def _param_list(self):
        params = [self.ib_vec]
        for wc, vec in self.hidden:
            params.extend((wc, vec))
        params.extend(self.fl)
        return params

    def _build_fused_call(self):
        n_hidden = len(self.hidden_l_nums)
        n_inputs = 2 + 2 * n_hidden + 2
        kernel = make_fused_forward_kernel(n_hidden)
        in_feats, in_pad = self.in_feats, self.in_pad
        out_feats, out_pad = self.out_feats, self.out_pad
        max_width = max([in_pad, out_pad] + [_pad_to(h) for h in self.hidden_l_nums])

        def fwd(x_flat, params):
            B = x_flat.shape[0]
            # Zero-pad features up to a lane-dense width (padded channels stay exactly zero
            # through every layer, so real-channel numerics are unchanged).
            x_p = jnp.zeros((B, in_pad), jnp.float32).at[:, :in_feats].set(x_flat)

            # Size VMEM limit from what is actually resident (safe margin, capped for v7x).
            param_bytes = sum(int(p.size) * p.dtype.itemsize for p in params)
            act_bytes = 4 * B * (in_pad + out_pad + 2 * max_width)
            vmem_limit = int(min(64 << 20, max(16 << 20, 4 * (param_bytes + act_bytes))))

            # TODO(synk): no batch grid — the whole batch is one block so train-mode BatchNorm
            # statistics stay exact; large batches need eval-mode BN folding or a stats pass.
            out_p = pl.pallas_call(
                kernel,
                out_shape=jax.ShapeDtypeStruct((B, out_pad), jnp.float32),
                in_specs=[_vmem_spec()] * n_inputs,
                out_specs=_vmem_spec(),
                compiler_params=pltpu.CompilerParams(vmem_limit_bytes=vmem_limit),
            )(x_p, *params)

            out = out_p[:, :out_feats]
            # Device-side NaN flag (no host sync inside forward).
            return out, jnp.isnan(out).any()

        self._fused_forward = jax.jit(fwd)

    def forward(self, x):
        x = x.reshape(-1, self.in_feats).astype(jnp.float32)
        return self._fused_forward(x, self._param_list())


# --------------------------------- main ------------------------------------ #

if __name__ == "__main__":
    IN_FEATS, OUT_FEATS = 16, 8
    HIDDEN = [32, 32]
    BATCH = 8

    key = jax.random.PRNGKey(0)
    # input shaped (batch, 4, 4) to exercise the x.view(-1, in_feats) step
    x = jax.random.normal(key, (BATCH, 4, 4), dtype=jnp.float32)

    net = FeedforwardFGNNet(IN_FEATS, OUT_FEATS, HIDDEN, drop_p=0.0, seed=0)
    out, nan_flag = net.forward(x)
    out, nan_flag = jax.block_until_ready((out, nan_flag))

    assert out.shape == (BATCH, OUT_FEATS)
    # Single host read of the device-computed NaN flag (matches the module's "x 3 is nan" raise
    # on the final output without serializing every intermediate layer).
    if bool(nan_flag):
        raise TypeError("x 3 is nan")
    print("KERNEL_OK")
</pallas_src>

<mosaic_0001>
module attributes {stable_mosaic.version = 11 : i64} {
  func.func @kernel(%arg0: memref<8x128xf32, #tpu.memory_space<vmem>>, %arg1: memref<2x128xf32, #tpu.memory_space<vmem>>, %arg2: memref<128x256xbf16, #tpu.memory_space<vmem>>, %arg3: memref<4x128xf32, #tpu.memory_space<vmem>>, %arg4: memref<128x256xbf16, #tpu.memory_space<vmem>>, %arg5: memref<4x128xf32, #tpu.memory_space<vmem>>, %arg6: memref<128x256xbf16, #tpu.memory_space<vmem>>, %arg7: memref<2x128xf32, #tpu.memory_space<vmem>>, %arg8: memref<8x128xf32, #tpu.memory_space<vmem>>) attributes {dimension_semantics = [], scalar_prefetch = 0 : i64, scratch_operands = 0 : i64, tpu.core_type = #tpu.core_type<tc>} {
    %c0 = arith.constant 0 : index
    %c0_0 = arith.constant 0 : index
    %0 = vector.load %arg1[%c0, %c0_0] : memref<2x128xf32, #tpu.memory_space<vmem>>, vector<2x128xf32>
    %c0_1 = arith.constant 0 : index
    %c0_2 = arith.constant 0 : index
    %1 = vector.load %arg0[%c0_1, %c0_2] : memref<8x128xf32, #tpu.memory_space<vmem>>, vector<8x128xf32>
    %2 = vector.extract_strided_slice %0 {offsets = [0, 0], sizes = [1, 128], strides = [1, 1]} : vector<2x128xf32> to vector<1x128xf32>
    %3 = vector.extract_strided_slice %0 {offsets = [1, 0], sizes = [1, 128], strides = [1, 1]} : vector<2x128xf32> to vector<1x128xf32>
    %cst = arith.constant dense<0.000000e+00> : vector<128xf32>
    %4 = vector.multi_reduction <add>, %1, %cst [0] : vector<8x128xf32> to vector<128xf32>
    %5 = vector.shape_cast %4 : vector<128xf32> to vector<1x128xf32>
    %cst_3 = arith.constant 8.000000e+00 : f32
    %6 = vector.broadcast %cst_3 : f32 to vector<1x128xf32>
    %7 = arith.divf %5, %6 : vector<1x128xf32>
    %8 = vector.broadcast %7 : vector<1x128xf32> to vector<8x128xf32>
    %9 = arith.subf %1, %8 : vector<8x128xf32>
    %10 = arith.mulf %9, %9 : vector<8x128xf32>
    %cst_4 = arith.constant dense<0.000000e+00> : vector<128xf32>
    %11 = vector.multi_reduction <add>, %10, %cst_4 [0] : vector<8x128xf32> to vector<128xf32>
    %12 = vector.shape_cast %11 : vector<128xf32> to vector<1x128xf32>
    %cst_5 = arith.constant 8.000000e+00 : f32
    %13 = vector.broadcast %cst_5 : f32 to vector<1x128xf32>
    %14 = arith.divf %12, %13 : vector<1x128xf32>
    %cst_6 = arith.constant 9.99999974E-6 : f32
    %15 = vector.broadcast %cst_6 : f32 to vector<1x128xf32>
    %16 = arith.addf %14, %15 : vector<1x128xf32>
    %17 = math.rsqrt %16 : vector<1x128xf32>
    %18 = vector.broadcast %7 : vector<1x128xf32> to vector<8x128xf32>
    %19 = arith.subf %1, %18 : vector<8x128xf32>
    %20 = vector.broadcast %17 : vector<1x128xf32> to vector<8x128xf32>
    %21 = arith.mulf %19, %20 : vector<8x128xf32>
    %22 = vector.broadcast %2 : vector<1x128xf32> to vector<8x128xf32>
    %23 = arith.mulf %21, %22 : vector<8x128xf32>
    %24 = vector.broadcast %3 : vector<1x128xf32> to vector<8x128xf32>
    %25 = arith.addf %23, %24 : vector<8x128xf32>
    %c0_7 = arith.constant 0 : index
    %c0_8 = arith.constant 0 : index
    %26 = vector.load %arg3[%c0_7, %c0_8] : memref<4x128xf32, #tpu.memory_space<vmem>>, vector<4x128xf32>
    %c0_9 = arith.constant 0 : index
    %c0_10 = arith.constant 0 : index
    %27 = vector.load %arg2[%c0_9, %c0_10] : memref<128x256xbf16, #tpu.memory_space<vmem>>, vector<128x256xbf16>
    %28 = vector.extract_strided_slice %26 {offsets = [0, 0], sizes = [1, 128], strides = [1, 1]} : vector<4x128xf32> to vector<1x128xf32>
    %29 = vector.extract_strided_slice %26 {offsets = [1, 0], sizes = [1, 128], strides = [1, 1]} : vector<4x128xf32> to vector<1x128xf32>
    %30 = arith.truncf %25 : vector<8x128xf32> to vector<8x128xbf16>
    %cst_11 = arith.constant dense<0.000000e+00> : vector<8x256xf32>
    %31 = tpu.matmul %30, %27, %cst_11 {dimension_numbers = #tpu.dot_dimension_numbers<[1], [0], [0], [1], [0, 0, 1, 1], [], []>} : vector<8x128xbf16>, vector<128x256xbf16>, vector<8x256xf32> -> vector<8x256xf32>
    %32 = vector.extract_strided_slice %31 {offsets = [0, 0], sizes = [8, 128], strides = [1, 1]} : vector<8x256xf32> to vector<8x128xf32>
    %33 = vector.extract_strided_slice %31 {offsets = [0, 128], sizes = [8, 128], strides = [1, 1]} : vector<8x256xf32> to vector<8x128xf32>
    %34 = arith.mulf %25, %25 : vector<8x128xf32>
    %cst_12 = arith.constant dense<0.000000e+00> : vector<8xf32>
    %35 = vector.multi_reduction <add>, %34, %cst_12 [1] : vector<8x128xf32> to vector<8xf32>
    %36 = vector.shape_cast %35 : vector<8xf32> to vector<8x1xf32>
    %37 = vector.broadcast %36 : vector<8x1xf32> to vector<8x128xf32>
    %38 = vector.broadcast %29 : vector<1x128xf32> to vector<8x128xf32>
    %39 = arith.mulf %37, %38 : vector<8x128xf32>
    %40 = vector.broadcast %28 : vector<1x128xf32> to vector<8x128xf32>
    %41 = arith.addf %39, %40 : vector<8x128xf32>
    %42 = arith.addf %41, %33 : vector<8x128xf32>
    %cst_13 = arith.constant 0.000000e+00 : f32
    %43 = vector.broadcast %cst_13 : f32 to vector<8x128xf32>
    %44 = arith.minimumf %42, %43 : vector<8x128xf32>
    %45 = math.exp %44 : vector<8x128xf32>
    %46 = arith.mulf %32, %45 : vector<8x128xf32>
    %47 = vector.extract_strided_slice %26 {offsets = [2, 0], sizes = [1, 128], strides = [1, 1]} : vector<4x128xf32> to vector<1x128xf32>
    %48 = vector.extract_strided_slice %26 {offsets = [3, 0], sizes = [1, 128], strides = [1, 1]} : vector<4x128xf32> to vector<1x128xf32>
    %cst_14 = arith.constant dense<0.000000e+00> : vector<128xf32>
    %49 = vector.multi_reduction <add>, %46, %cst_14 [0] : vector<8x128xf32> to vector<128xf32>
    %50 = vector.shape_cast %49 : vector<128xf32> to vector<1x128xf32>
    %cst_15 = arith.constant 8.000000e+00 : f32
    %51 = vector.broadcast %cst_15 : f32 to vector<1x128xf32>
    %52 = arith.divf %50, %51 : vector<1x128xf32>
    %53 = vector.broadcast %52 : vector<1x128xf32> to vector<8x128xf32>
    %54 = arith.subf %46, %53 : vector<8x128xf32>
    %55 = arith.mulf %54, %54 : vector<8x128xf32>
    %cst_16 = arith.constant dense<0.000000e+00> : vector<128xf32>
    %56 = vector.multi_reduction <add>, %55, %cst_16 [0] : vector<8x128xf32> to vector<128xf32>
    %57 = vector.shape_cast %56 : vector<128xf32> to vector<1x128xf32>
    %cst_17 = arith.constant 8.000000e+00 : f32
    %58 = vector.broadcast %cst_17 : f32 to vector<1x128xf32>
    %59 = arith.divf %57, %58 : vector<1x128xf32>
    %cst_18 = arith.constant 9.99999974E-6 : f32
    %60 = vector.broadcast %cst_18 : f32 to vector<1x128xf32>
    %61 = arith.addf %59, %60 : vector<1x128xf32>
    %62 = math.rsqrt %61 : vector<1x128xf32>
    %63 = vector.broadcast %52 : vector<1x128xf32> to vector<8x128xf32>
    %64 = arith.subf %46, %63 : vector<8x128xf32>
    %65 = vector.broadcast %62 : vector<1x128xf32> to vector<8x128xf32>
    %66 = arith.mulf %64, %65 : vector<8x128xf32>
    %67 = vector.broadcast %47 : vector<1x128xf32> to vector<8x128xf32>
    %68 = arith.mulf %66, %67 : vector<8x128xf32>
    %69 = vector.broadcast %48 : vector<1x128xf32> to vector<8x128xf32>
    %70 = arith.addf %68, %69 : vector<8x128xf32>
    %c0_19 = arith.constant 0 : index
    %c0_20 = arith.constant 0 : index
    %71 = vector.load %arg5[%c0_19, %c0_20] : memref<4x128xf32, #tpu.memory_space<vmem>>, vector<4x128xf32>
    %c0_21 = arith.constant 0 : index
    %c0_22 = arith.constant 0 : index
    %72 = vector.load %arg4[%c0_21, %c0_22] : memref<128x256xbf16, #tpu.memory_space<vmem>>, vector<128x256xbf16>
    %73 = vector.extract_strided_slice %71 {offsets = [0, 0], sizes = [1, 128], strides = [1, 1]} : vector<4x128xf32> to vector<1x128xf32>
    %74 = vector.extract_strided_slice %71 {offsets = [1, 0], sizes = [1, 128], strides = [1, 1]} : vector<4x128xf32> to vector<1x128xf32>
    %75 = arith.truncf %70 : vector<8x128xf32> to vector<8x128xbf16>
    %cst_23 = arith.constant dense<0.000000e+00> : vector<8x256xf32>
    %76 = tpu.matmul %75, %72, %cst_23 {dimension_numbers = #tpu.dot_dimension_numbers<[1], [0], [0], [1], [0, 0, 1, 1], [], []>} : vector<8x128xbf16>, vector<128x256xbf16>, vector<8x256xf32> -> vector<8x256xf32>
    %77 = vector.extract_strided_slice %76 {offsets = [0, 0], sizes = [8, 128], strides = [1, 1]} : vector<8x256xf32> to vector<8x128xf32>
    %78 = vector.extract_strided_slice %76 {offsets = [0, 128], sizes = [8, 128], strides = [1, 1]} : vector<8x256xf32> to vector<8x128xf32>
    %79 = arith.mulf %70, %70 : vector<8x128xf32>
    %cst_24 = arith.constant dense<0.000000e+00> : vector<8xf32>
    %80 = vector.multi_reduction <add>, %79, %cst_24 [1] : vector<8x128xf32> to vector<8xf32>
    %81 = vector.shape_cast %80 : vector<8xf32> to vector<8x1xf32>
    %82 = vector.broadcast %81 : vector<8x1xf32> to vector<8x128xf32>
    %83 = vector.broadcast %74 : vector<1x128xf32> to vector<8x128xf32>
    %84 = arith.mulf %82, %83 : vector<8x128xf32>
    %85 = vector.broadcast %73 : vector<1x128xf32> to vector<8x128xf32>
    %86 = arith.addf %84, %85 : vector<8x128xf32>
    %87 = arith.addf %86, %78 : vector<8x128xf32>
    %cst_25 = arith.constant 0.000000e+00 : f32
    %88 = vector.broadcast %cst_25 : f32 to vector<8x128xf32>
    %89 = arith.minimumf %87, %88 : vector<8x128xf32>
    %90 = math.exp %89 : vector<8x128xf32>
    %91 = arith.mulf %77, %90 : vector<8x128xf32>
    %92 = vector.extract_strided_slice %71 {offsets = [2, 0], sizes = [1, 128], strides = [1, 1]} : vector<4x128xf32> to vector<1x128xf32>
    %93 = vector.extract_strided_slice %71 {offsets = [3, 0], sizes = [1, 128], strides = [1, 1]} : vector<4x128xf32> to vector<1x128xf32>
    %cst_26 = arith.constant dense<0.000000e+00> : vector<128xf32>
    %94 = vector.multi_reduction <add>, %91, %cst_26 [0] : vector<8x128xf32> to vector<128xf32>
    %95 = vector.shape_cast %94 : vector<128xf32> to vector<1x128xf32>
    %cst_27 = arith.constant 8.000000e+00 : f32
    %96 = vector.broadcast %cst_27 : f32 to vector<1x128xf32>
    %97 = arith.divf %95, %96 : vector<1x128xf32>
    %98 = vector.broadcast %97 : vector<1x128xf32> to vector<8x128xf32>
    %99 = arith.subf %91, %98 : vector<8x128xf32>
    %100 = arith.mulf %99, %99 : vector<8x128xf32>
    %cst_28 = arith.constant dense<0.000000e+00> : vector<128xf32>
    %101 = vector.multi_reduction <add>, %100, %cst_28 [0] : vector<8x128xf32> to vector<128xf32>
    %102 = vector.shape_cast %101 : vector<128xf32> to vector<1x128xf32>
    %cst_29 = arith.constant 8.000000e+00 : f32
    %103 = vector.broadcast %cst_29 : f32 to vector<1x128xf32>
    %104 = arith.divf %102, %103 : vector<1x128xf32>
    %cst_30 = arith.constant 9.99999974E-6 : f32
    %105 = vector.broadcast %cst_30 : f32 to vector<1x128xf32>
    %106 = arith.addf %104, %105 : vector<1x128xf32>
    %107 = math.rsqrt %106 : vector<1x128xf32>
    %108 = vector.broadcast %97 : vector<1x128xf32> to vector<8x128xf32>
    %109 = arith.subf %91, %108 : vector<8x128xf32>
    %110 = vector.broadcast %107 : vector<1x128xf32> to vector<8x128xf32>
    %111 = arith.mulf %109, %110 : vector<8x128xf32>
    %112 = vector.broadcast %92 : vector<1x128xf32> to vector<8x128xf32>
    %113 = arith.mulf %111, %112 : vector<8x128xf32>
    %114 = vector.broadcast %93 : vector<1x128xf32> to vector<8x128xf32>
    %115 = arith.addf %113, %114 : vector<8x128xf32>
    %c0_31 = arith.constant 0 : index
    %c0_32 = arith.constant 0 : index
    %116 = vector.load %arg7[%c0_31, %c0_32] : memref<2x128xf32, #tpu.memory_space<vmem>>, vector<2x128xf32>
    %c0_33 = arith.constant 0 : index
    %c0_34 = arith.constant 0 : index
    %117 = vector.load %arg6[%c0_33, %c0_34] : memref<128x256xbf16, #tpu.memory_space<vmem>>, vector<128x256xbf16>
    %118 = vector.extract_strided_slice %116 {offsets = [0, 0], sizes = [1, 128], strides = [1, 1]} : vector<2x128xf32> to vector<1x128xf32>
    %119 = vector.extract_strided_slice %116 {offsets = [1, 0], sizes = [1, 128], strides = [1, 1]} : vector<2x128xf32> to vector<1x128xf32>
    %120 = arith.truncf %115 : vector<8x128xf32> to vector<8x128xbf16>
    %cst_35 = arith.constant dense<0.000000e+00> : vector<8x256xf32>
    %121 = tpu.matmul %120, %117, %cst_35 {dimension_numbers = #tpu.dot_dimension_numbers<[1], [0], [0], [1], [0, 0, 1, 1], [], []>} : vector<8x128xbf16>, vector<128x256xbf16>, vector<8x256xf32> -> vector<8x256xf32>
    %122 = vector.extract_strided_slice %121 {offsets = [0, 0], sizes = [8, 128], strides = [1, 1]} : vector<8x256xf32> to vector<8x128xf32>
    %123 = vector.extract_strided_slice %121 {offsets = [0, 128], sizes = [8, 128], strides = [1, 1]} : vector<8x256xf32> to vector<8x128xf32>
    %124 = arith.mulf %115, %115 : vector<8x128xf32>
    %cst_36 = arith.constant dense<0.000000e+00> : vector<8xf32>
    %125 = vector.multi_reduction <add>, %124, %cst_36 [1] : vector<8x128xf32> to vector<8xf32>
    %126 = vector.shape_cast %125 : vector<8xf32> to vector<8x1xf32>
    %127 = vector.broadcast %126 : vector<8x1xf32> to vector<8x128xf32>
    %128 = vector.broadcast %119 : vector<1x128xf32> to vector<8x128xf32>
    %129 = arith.mulf %127, %128 : vector<8x128xf32>
    %130 = vector.broadcast %118 : vector<1x128xf32> to vector<8x128xf32>
    %131 = arith.addf %129, %130 : vector<8x128xf32>
    %132 = arith.addf %131, %123 : vector<8x128xf32>
    %cst_37 = arith.constant 0.000000e+00 : f32
    %133 = vector.broadcast %cst_37 : f32 to vector<8x128xf32>
    %134 = arith.minimumf %132, %133 : vector<8x128xf32>
    %135 = math.exp %134 : vector<8x128xf32>
    %136 = arith.mulf %122, %135 : vector<8x128xf32>
    %c0_38 = arith.constant 0 : index
    %c0_39 = arith.constant 0 : index
    %137 = vector.load %arg8[%c0_38, %c0_39] : memref<8x128xf32, #tpu.memory_space<vmem>>, vector<8x128xf32>
    tpu.vector_store %arg8[%c0_38, %c0_39], %136 {strides = array<i32>} : memref<8x128xf32, #tpu.memory_space<vmem>>, vector<8x128xf32>,
    return
  }
}

</mosaic_0001>

<bundles_post_ra>
// kernel: fwd.1
= control target key start
LH: loop header
LB: loop body
LE: loop exit
PB: predicated region body
PF: predicated region fallthrough
CT: control target
= control target key end

     0   :  { %13 = vsyncpa [#allocation3], 0  ;;  %s948_s0 = inlined_call_operand.vmem [shape: f32[8,128], index: 0, kind: input, shape index: {}]   ;;  %s949_s1 = inlined_call_operand.vmem [shape: f32[2,128], index: 1, kind: input, shape index: {}]   ;;  %s950_s2 = inlined_call_operand.hbm [shape: bf16[128,256], index: 2, kind: input, shape index: {}]   ;;  %s951_s3 = inlined_call_operand.vmem [shape: f32[4,128], index: 3, kind: input, shape index: {}]   ;;  %s952_s4 = inlined_call_operand.hbm [shape: bf16[128,256], index: 4, kind: input, shape index: {}]   ;;  %s953_s5 = inlined_call_operand.vmem [shape: f32[4,128], index: 5, kind: input, shape index: {}]   ;;  %s954_s6 = inlined_call_operand.hbm [shape: bf16[128,256], index: 6, kind: input, shape index: {}]   ;;  %s955_s7 = inlined_call_operand.vmem [shape: f32[2,128], index: 7, kind: input, shape index: {}]   ;;  %s956_s8 = inlined_call_operand.vmem [shape: f32[8,128], index: 8, kind: output, shape index: {}]  }
   0x1   :  { %14 = vsyncpa [#allocation5], 0  ;;  %s841_s27 = smov [#allocation4]   ;;  %s842_s29 = smov [#allocation2]  }
   0x2   :  { %s38_s28 = sshll.u32 %s841_s27, 4  ;;  %s24_s30 = sshll.u32 %s842_s29, 4  ;;  %s39_s28 = int_to_ptr.vmem [resolvable:$true] %s38_s28  ;;  %s25_s30 = int_to_ptr.vmem [resolvable:$true] %s24_s30 }
   0x3   :  { %s785_s9 = scalar_lea.vmem %s39_s28, 2048  ;;  %p790_p1 = scmp.lt.s32.totalorder %s39_s28, %s39_s28 }
   0x4   :  { %p786_p0 = scmp.ne.s32.totalorder %s39_s28, %s785_s9  ;;  %p791_p2 = scmp.lt.s32.totalorder %s785_s9, %s785_s9 }
   0x6   :  { %p792_p3 = por %p791_p2, %p790_p1 }
   0x8   :  { %p793_p4 = pnand %p792_p3, %p786_p0 }
   0xa   :  { %796 = shalt.err (!%p793_p4)
}
   0xb   :  { %s843_s10 = smov 128   ;;  %s844_s11 = smov 8  }
   0xc   :  { %44 = dma.hbm_to_vmem [thread:$0]  %s952_s4, 2048, %s39_s28, [#allocation5], %s843_s10, %s843_s10, %s844_s11  }
   0xd   :  { %s805_s14 = scalar_lea.vmem %s25_s30, 2048  ;;  %p810_p6 = scmp.lt.s32.totalorder %s25_s30, %s25_s30 }
   0xe   :  { %p806_p5 = scmp.ne.s32.totalorder %s25_s30, %s805_s14  ;;  %p811_p7 = scmp.lt.s32.totalorder %s805_s14, %s805_s14 }
  0x10   :  { %p812_p8 = por %p811_p7, %p810_p6 }
  0x12   :  { %p813_p9 = pnand %p812_p8, %p806_p5 }
  0x14   :  { %816 = shalt.err (!%p813_p9)
}
  0x15   :  { %30 = dma.hbm_to_vmem [thread:$0]  %s950_s2, 2048, %s25_s30, [#allocation3], %s843_s10, %s843_s10, %s844_s11  }
  0x16   :  { %s845_s17 = smov [#allocation6]  }
  0x17   :  { %s52_s18 = sshll.u32 %s845_s17, 4  ;;  %s53_s18 = int_to_ptr.vmem [resolvable:$true] %s52_s18 }
  0x18   :  { %s825_s19 = scalar_lea.vmem %s53_s18, 2048  ;;  %p830_p11 = scmp.lt.s32.totalorder %s53_s18, %s53_s18 }
  0x19   :  { %p826_p10 = scmp.ne.s32.totalorder %s53_s18, %s825_s19  ;;  %p831_p12 = scmp.lt.s32.totalorder %s825_s19, %s825_s19 }
  0x1b   :  { %p832_p13 = por %p831_p12, %p830_p11 }
  0x1d   :  { %p833_p0 = pnand %p832_p13, %p826_p10 }
  0x1f   :  { %836 = shalt.err (!%p833_p0)
}
  0x20   :  { %58 = dma.hbm_to_vmem [thread:$0]  %s954_s6, 2048, %s53_s18, [#allocation5], %s843_s10, %s843_s10, %s844_s11  }
  0x21   :  { %837 = dma.done.wait [#allocation3], 2048  }
  0x22   :  { %838 = vsyncadd [#allocation3], 4294965248 }
  0x23   :  { %839 = dma.done.wait [#allocation5], 4096  }
  0x24   :  { %840 = vsyncadd [#allocation5], 4294963200  ;;  %v846_v0 = vmov 0   ;;  %v693_v1 = vld [vmem:[#allocation2 + $0x74] ss:$8 sps:$4 sm:$0xff]   ;;  %v72_v10 = vld [vmem:[%s948_s0] sm:$0xff]  ;;  %v93_v35 = vlaneseq }
  0x25   :  { %233 = vmatprep.mubr.bf16.mxu0 %v846_v0  ;;  %419 = vmatprep.mubr.bf16.mxu1 %v846_v0  ;;  %v695_v2 = vld [vmem:[#allocation2 + $0x70] ss:$8 sps:$4 sm:$0xff]   ;;  %v696_v3 = vld [vmem:[#allocation2 + $0x64] ss:$8 sps:$4 sm:$0xff]   ;;  %v698_v4 = vld [vmem:[#allocation2 + $0x60] ss:$8 sps:$4 sm:$0xff]  }
  0x26   :  { %201 = vmatprep.subr.bf16.mxu0 %v693_v1  ;;  %v699_v5 = vld [vmem:[#allocation2 + $0x54] ss:$8 sps:$4 sm:$0xff]   ;;  %v701_v6 = vld [vmem:[#allocation2 + $0x50] ss:$8 sps:$4 sm:$0xff]   ;;  %v702_v7 = vld [vmem:[#allocation2 + $0x44] ss:$8 sps:$4 sm:$0xff]  }
  0x27   :  { %202 = vmatpush1.bf16.msra.mxu0 %v695_v2  ;;  %v704_v8 = vld [vmem:[#allocation2 + $0x40] ss:$8 sps:$4 sm:$0xff]   ;;  %v705_v9 = vld [vmem:[#allocation2 + $0x34] ss:$8 sps:$4 sm:$0xff]   ;;  %v73_v11 = vrot.slane %v72_v10, 4  ;;  %v906_v36 = vshrl.u32 %v93_v35, 7 }
  0x28   :  { %203 = vmatprep.subr.bf16.mxu0 %v696_v3  ;;  %v707_v12 = vld [vmem:[#allocation2 + $0x30] ss:$8 sps:$4 sm:$0xff]   ;;  %v708_v13 = vld [vmem:[#allocation2 + $0x24] ss:$8 sps:$4 sm:$0xff]   ;;  %v710_v16 = vld [vmem:[#allocation2 + $0x20] ss:$8 sps:$4 sm:$0xff]  }
  0x29   :  { %v74_v14 = vadd.f32 %v73_v11, %v72_v10  ;;  %v711_v17 = vld [vmem:[#allocation2 + $0x14] ss:$8 sps:$4 sm:$0xff]   ;;  %v713_v21 = vld [vmem:[#allocation2 + $0x10] ss:$8 sps:$4 sm:$0xff]   ;;  %v714_v22 = vld [vmem:[#allocation2 + $0x4] ss:$8 sps:$4 sm:$0xff]  }
  0x2a   :  { %v716_v25 = vld [vmem:[#allocation2] ss:$8 sps:$4 sm:$0xff]   ;;  %v909_v37 = vsub.s32 0, %v906_v36  ;;  %v915_v39 = vsub.s32 1, %v906_v36  ;;  %v717_v48 = vld [vmem:[#allocation4 + $0x74] ss:$8 sps:$4 sm:$0xff]  }
  0x2b   :  { %204 = vmatpush1.bf16.msra.mxu0 %v698_v4  ;;  %v75_v15 = vrot.slane %v74_v14, 2  ;;  %v71_v38 = vld [vmem:[%s949_s1] sm:$0x3]  ;;  %v719_v49 = vld [vmem:[#allocation4 + $0x70] ss:$8 sps:$4 sm:$0xff]   ;;  %387 = vmatprep.subr.bf16.mxu1 %v717_v48 }
  0x2c   :  { %205 = vmatprep.subr.bf16.mxu0 %v699_v5  ;;  %v96_v40 = vrot.slane %v71_v38, %v909_v37  ;;  %v101_v43 = vrot.slane %v71_v38, %v915_v39  ;;  %v720_v50 = vld [vmem:[#allocation4 + $0x64] ss:$8 sps:$4 sm:$0xff]   ;;  %388 = vmatpush1.bf16.msra.mxu1 %v719_v49  ;;  %v722_v51 = vld [vmem:[#allocation4 + $0x60] ss:$8 sps:$4 sm:$0xff]   ;;  %v723_v52 = vld [vmem:[#allocation4 + $0x54] ss:$8 sps:$4 sm:$0xff]  }
  0x2d   :  { %v76_v18 = vadd.f32 %v75_v15, %v74_v14  ;;  %389 = vmatprep.subr.bf16.mxu1 %v720_v50  ;;  %v725_v53 = vld [vmem:[#allocation4 + $0x50] ss:$8 sps:$4 sm:$0xff]   ;;  %v726_v54 = vld [vmem:[#allocation4 + $0x44] ss:$8 sps:$4 sm:$0xff]   ;;  %v728_v55 = vld [vmem:[#allocation4 + $0x40] ss:$8 sps:$4 sm:$0xff]  }
  0x2e   :  { %v729_v56 = vld [vmem:[#allocation4 + $0x34] ss:$8 sps:$4 sm:$0xff]   ;;  %v731_v57 = vld [vmem:[#allocation4 + $0x30] ss:$8 sps:$4 sm:$0xff]   ;;  %v732_v58 = vld [vmem:[#allocation4 + $0x24] ss:$8 sps:$4 sm:$0xff]  }
  0x2f   :  { %206 = vmatpush1.bf16.msra.mxu0 %v701_v6  ;;  %v77_v19 = vrot.slane %v76_v18, 1  ;;  %v734_v59 = vld [vmem:[#allocation4 + $0x20] ss:$8 sps:$4 sm:$0xff]   ;;  %v735_v60 = vld [vmem:[#allocation4 + $0x14] ss:$8 sps:$4 sm:$0xff]  }
  0x30   :  { %207 = vmatprep.subr.bf16.mxu0 %v702_v7  ;;  %390 = vmatpush1.bf16.msra.mxu1 %v722_v51  ;;  %v737_v61 = vld [vmem:[#allocation4 + $0x10] ss:$8 sps:$4 sm:$0xff]   ;;  %v738_v62 = vld [vmem:[#allocation4 + $0x4] ss:$8 sps:$4 sm:$0xff]   ;;  %v740_v63 = vld [vmem:[#allocation4] ss:$8 sps:$4 sm:$0xff]  }
  0x31   :  { %v78_v20 = vadd.f32 %v77_v19, %v76_v18  ;;  %391 = vmatprep.subr.bf16.mxu1 %v723_v52  ;;  %v744_v48 = vld [vmem:[#allocation6 + $0x60] ss:$8 sps:$4 sm:$0xff]   ;;  %v749_v49 = vld [vmem:[#allocation6 + $0x54] ss:$8 sps:$4 sm:$0xff]   ;;  %v747_v50 = vld [vmem:[#allocation6 + $0x50] ss:$8 sps:$4 sm:$0xff]  }
  0x32   :  { %v752_v51 = vld [vmem:[#allocation6 + $0x44] ss:$8 sps:$4 sm:$0xff]   ;;  %v750_v52 = vld [vmem:[#allocation6 + $0x40] ss:$8 sps:$4 sm:$0xff]  }
  0x33   :  { %208 = vmatpush1.bf16.msra.mxu0 %v704_v8  ;;  %v80_v23 = vmul.f32 0.125, %v78_v20 }
  0x34   :  { %209 = vmatprep.subr.bf16.mxu0 %v705_v9  ;;  %392 = vmatpush1.bf16.msra.mxu1 %v725_v53  ;;  %v755_v53 = vld [vmem:[#allocation6 + $0x34] ss:$8 sps:$4 sm:$0xff]  }
  0x35   :  { %v81_v24 = vsub.f32 %v72_v10, %v80_v23  ;;  %393 = vmatprep.subr.bf16.mxu1 %v726_v54  ;;  %v753_v54 = vld [vmem:[#allocation6 + $0x30] ss:$8 sps:$4 sm:$0xff]  }
  0x37   :  { %210 = vmatpush1.bf16.msra.mxu0 %v707_v12  ;;  %v82_v26 = vmul.f32 %v81_v24, %v81_v24 }
  0x38   :  { %211 = vmatprep.subr.bf16.mxu0 %v708_v13  ;;  %394 = vmatpush1.bf16.msra.mxu1 %v728_v55  ;;  %v758_v55 = vld [vmem:[#allocation6 + $0x24] ss:$8 sps:$4 sm:$0xff]  }
  0x39   :  { %v83_v27 = vrot.slane %v82_v26, 4  ;;  %395 = vmatprep.subr.bf16.mxu1 %v729_v56  ;;  %v756_v56 = vld [vmem:[#allocation6 + $0x20] ss:$8 sps:$4 sm:$0xff]  }
  0x3b   :  { %212 = vmatpush1.bf16.msra.mxu0 %v710_v16  ;;  %v84_v28 = vadd.f32 %v83_v27, %v82_v26 }
  0x3c   :  { %213 = vmatprep.subr.bf16.mxu0 %v711_v17  ;;  %396 = vmatpush1.bf16.msra.mxu1 %v731_v57  ;;  %v761_v57 = vld [vmem:[#allocation6 + $0x14] ss:$8 sps:$4 sm:$0xff]  }
  0x3d   :  { %v85_v29 = vrot.slane %v84_v28, 2  ;;  %397 = vmatprep.subr.bf16.mxu1 %v732_v58  ;;  %v759_v58 = vld [vmem:[#allocation6 + $0x10] ss:$8 sps:$4 sm:$0xff]  }
  0x3f   :  { %214 = vmatpush1.bf16.msra.mxu0 %v713_v21  ;;  %v86_v30 = vadd.f32 %v85_v29, %v84_v28 }
  0x40   :  { %215 = vmatprep.subr.bf16.mxu0 %v714_v22  ;;  %398 = vmatpush1.bf16.msra.mxu1 %v734_v59  ;;  %v764_v59 = vld [vmem:[#allocation6 + $0x4] ss:$8 sps:$4 sm:$0xff]  }
  0x41   :  { %v87_v31 = vrot.slane %v86_v30, 1  ;;  %399 = vmatprep.subr.bf16.mxu1 %v735_v60  ;;  %v762_v60 = vld [vmem:[#allocation6] ss:$8 sps:$4 sm:$0xff]  }
  0x43   :  { %216 = vmatpush1.bf16.msra.mxu0 %v716_v25  ;;  %v88_v32 = vadd.f32 %v87_v31, %v86_v30 }
  0x44   :  { %400 = vmatpush1.bf16.msra.mxu1 %v737_v61  ;;  %v289_v61 = vld [vmem:[%s953_s5] sm:$0xf] }
  0x45   :  { %v89_v33 = vmul.f32 0.125, %v88_v32  ;;  %401 = vmatprep.subr.bf16.mxu1 %v738_v62  ;;  %v281_v32 = vsub.s32 2, %v906_v36  ;;  %v434_v62 = vrot.slane %v289_v61, %v915_v39 }
  0x47   :  { %v90_v34 = vadd.f32 1e-05, %v89_v33  ;;  %v286_v33 = vsub.s32 3, %v906_v36 }
  0x48   :  { %402 = vmatpush1.bf16.msra.mxu1 %v740_v63 }
  0x49   :  { %765 = vrsqrt.f32 %v90_v34 }
  0x56   :  { %v766_v41 = vpop.eup %765 }
  0x57   :  { %v92_v42 = vmul.f32 %v766_v41, %v81_v24 }
  0x59   :  { %v97_v44 = vmul.f32 %v96_v40, %v92_v42 }
  0x5b   :  { %v102_v45 = vadd.f32 %v101_v43, %v97_v44 }
  0x5d   :  { %v120_v46 = vpack.c.bf16 %v102_v45, %v102_v45  ;;  %v242_v47 = vmul.f32 %v102_v45, %v102_v45  ;;  %v741_v45 = vld [vmem:[#allocation6 + $0x70] ss:$8 sps:$4 sm:$0xff]  }
  0x5f   :  { %234 = vmatmul.mubr.bf16.vlgmr.msra.gmra.mxu0 %v120_v46  ;;  %243 = vadd.xlane.f32.xlu0 %v242_v47  ;;  %v743_v46 = vld [vmem:[#allocation6 + $0x74] ss:$8 sps:$4 sm:$0xff]   ;;  %v746_v47 = vld [vmem:[#allocation6 + $0x64] ss:$8 sps:$4 sm:$0xff]  }
  0x60   :  { %605 = vmatprep.mubr.bf16.mxu0 %v846_v0  ;;  %v103_v0 = vld [vmem:[%s951_s3] sm:$0xf]  ;;  %573 = vmatprep.subr.bf16.mxu0 %v743_v46 }
  0x61   :  { %v248_v1 = vrot.slane %v103_v0, %v915_v39  ;;  %v253_v4 = vrot.slane %v103_v0, %v909_v37  ;;  %v282_v34 = vrot.slane %v103_v0, %v281_v32  ;;  %v287_v40 = vrot.slane %v103_v0, %v286_v33  ;;  %574 = vmatpush1.bf16.msra.mxu0 %v741_v45 }
  0x62   :  { %575 = vmatprep.subr.bf16.mxu0 %v746_v47 }
  0x65   :  { %576 = vmatpush1.bf16.msra.mxu0 %v744_v48 }
  0x66   :  { %577 = vmatprep.subr.bf16.mxu0 %v749_v49 }
  0x69   :  { %578 = vmatpush1.bf16.msra.mxu0 %v747_v50 }
  0x6a   :  { %579 = vmatprep.subr.bf16.mxu0 %v752_v51 }
  0x6d   :  { %580 = vmatpush1.bf16.msra.mxu0 %v750_v52 }
  0x6e   :  { %581 = vmatprep.subr.bf16.mxu0 %v755_v53 }
  0x71   :  { %582 = vmatpush1.bf16.msra.mxu0 %v753_v54 }
  0x72   :  { %583 = vmatprep.subr.bf16.mxu0 %v758_v55 }
  0x75   :  { %584 = vmatpush1.bf16.msra.mxu0 %v756_v56 }
  0x76   :  { %585 = vmatprep.subr.bf16.mxu0 %v761_v57 }
  0x79   :  { %586 = vmatpush1.bf16.msra.mxu0 %v759_v58 }
  0x7a   :  { %587 = vmatprep.subr.bf16.mxu0 %v764_v59 }
  0x7d   :  { %588 = vmatpush1.bf16.msra.mxu0 %v762_v60 }
  0xe8   :  { %v244_v2 = vpop.xlane.xlu0 %243 }
  0xe9   :  { %v249_v3 = vmul.f32 %v248_v1, %v244_v2  ;;  %v439_v1 = vrot.slane %v289_v61, %v909_v37 }
  0xeb   :  { %v254_v5 = vadd.f32 %v253_v4, %v249_v3 }
 0x11f   :  { %v235_v6 = vpop.f32.mrf.mxu0 }
 0x121   :  { %v237_v7 = vpop.f32.mrf.mxu0 }
 0x122   :  { %v255_v8 = vadd.f32 %v254_v5, %v237_v7 }
 0x123   :  { %v239_v9 = vpop.f32.mrf.mxu0 }
 0x124   :  { %v256_v10 = vmin.f32 %v255_v8, 0.0 }
 0x125   :  { %v240_v11 = vpop.f32.mrf.mxu0 }
 0x126   :  { %v257_v12 = vmul.f32 1.442695, %v256_v10 }
 0x128   :  { %767 = vpow2.f32 %v257_v12 }
 0x135   :  { %v768_v13 = vpop.eup %767 }
 0x136   :  { %v259_v14 = vmul.f32 %v768_v13, %v235_v6 }
 0x138   :  { %v260_v15 = vrot.slane %v259_v14, 4 }
 0x13a   :  { %v261_v16 = vadd.f32 %v260_v15, %v259_v14 }
 0x13c   :  { %v262_v17 = vrot.slane %v261_v16, 2 }
 0x13e   :  { %v263_v18 = vadd.f32 %v262_v17, %v261_v16 }
 0x140   :  { %v264_v19 = vrot.slane %v263_v18, 1 }
 0x142   :  { %v265_v20 = vadd.f32 %v264_v19, %v263_v18 }
 0x144   :  { %v266_v21 = vmul.f32 0.125, %v265_v20 }
 0x146   :  { %v267_v22 = vsub.f32 %v259_v14, %v266_v21 }
 0x148   :  { %v268_v23 = vmul.f32 %v267_v22, %v267_v22 }
 0x14a   :  { %v269_v24 = vrot.slane %v268_v23, 4 }
 0x14c   :  { %v270_v25 = vadd.f32 %v269_v24, %v268_v23 }
 0x14e   :  { %v271_v26 = vrot.slane %v270_v25, 2 }
 0x150   :  { %v272_v27 = vadd.f32 %v271_v26, %v270_v25 }
 0x152   :  { %v273_v28 = vrot.slane %v272_v27, 1 }
 0x154   :  { %v274_v29 = vadd.f32 %v273_v28, %v272_v27 }
 0x156   :  { %v275_v30 = vmul.f32 0.125, %v274_v29  ;;  %v468_v29 = vrot.slane %v289_v61, %v281_v32 }
 0x158   :  { %v276_v31 = vadd.f32 1e-05, %v275_v30 }
 0x15a   :  { %769 = vrsqrt.f32 %v276_v31 }
 0x167   :  { %v770_v35 = vpop.eup %769 }
 0x168   :  { %v278_v38 = vmul.f32 %v770_v35, %v267_v22 }
 0x16a   :  { %v283_v41 = vmul.f32 %v282_v34, %v278_v38  ;;  %v473_v34 = vrot.slane %v289_v61, %v286_v33 }
 0x16c   :  { %v288_v42 = vadd.f32 %v287_v40, %v283_v41 }
 0x16e   :  { %v428_v43 = vmul.f32 %v288_v42, %v288_v42  ;;  %v306_v44 = vpack.c.bf16 %v288_v42, %v288_v42  ;;  %v475_v42 = vld [vmem:[%s955_s7] sm:$0x3] }
 0x16f   :  { %v625_v32 = vrot.slane %v475_v42, %v909_v37 }
 0x170   :  { %429 = vadd.xlane.f32.xlu0 %v428_v43  ;;  %420 = vmatmul.mubr.bf16.vlgmr.msra.gmra.mxu1 %v306_v44  ;;  %v620_v43 = vrot.slane %v475_v42, %v915_v39 }
 0x1f9   :  { %v430_v63 = vpop.xlane.xlu0 %429 }
 0x1fa   :  { %v435_v0 = vmul.f32 %v434_v62, %v430_v63 }
 0x1fc   :  { %v440_v3 = vadd.f32 %v439_v1, %v435_v0 }
 0x230   :  { %v421_v2 = vpop.f32.mrf.mxu1 }
 0x232   :  { %v423_v4 = vpop.f32.mrf.mxu1 }
 0x233   :  { %v441_v5 = vadd.f32 %v440_v3, %v423_v4 }
 0x234   :  { %v425_v6 = vpop.f32.mrf.mxu1 }
 0x235   :  { %v442_v7 = vmin.f32 %v441_v5, 0.0 }
 0x236   :  { %v426_v8 = vpop.f32.mrf.mxu1 }
 0x237   :  { %v443_v9 = vmul.f32 1.442695, %v442_v7 }
 0x239   :  { %771 = vpow2.f32 %v443_v9 }
 0x246   :  { %v772_v10 = vpop.eup %771 }
 0x247   :  { %v445_v11 = vmul.f32 %v772_v10, %v421_v2 }
 0x249   :  { %v446_v12 = vrot.slane %v445_v11, 4 }
 0x24b   :  { %v447_v13 = vadd.f32 %v446_v12, %v445_v11 }
 0x24d   :  { %v448_v14 = vrot.slane %v447_v13, 2 }
 0x24f   :  { %v449_v15 = vadd.f32 %v448_v14, %v447_v13 }
 0x251   :  { %v450_v16 = vrot.slane %v449_v15, 1 }
 0x253   :  { %v451_v17 = vadd.f32 %v450_v16, %v449_v15 }
 0x255   :  { %v452_v18 = vmul.f32 0.125, %v451_v17 }
 0x257   :  { %v453_v19 = vsub.f32 %v445_v11, %v452_v18 }
 0x259   :  { %v454_v20 = vmul.f32 %v453_v19, %v453_v19 }
 0x25b   :  { %v455_v21 = vrot.slane %v454_v20, 4 }
 0x25d   :  { %v456_v22 = vadd.f32 %v455_v21, %v454_v20 }
 0x25f   :  { %v457_v23 = vrot.slane %v456_v22, 2 }
 0x261   :  { %v458_v24 = vadd.f32 %v457_v23, %v456_v22 }
 0x263   :  { %v459_v25 = vrot.slane %v458_v24, 1 }
 0x265   :  { %v460_v26 = vadd.f32 %v459_v25, %v458_v24 }
 0x267   :  { %v461_v27 = vmul.f32 0.125, %v460_v26 }
 0x269   :  { %v462_v28 = vadd.f32 1e-05, %v461_v27 }
 0x26b   :  { %773 = vrsqrt.f32 %v462_v28 }
 0x278   :  { %v774_v30 = vpop.eup %773 }
 0x279   :  { %v464_v31 = vmul.f32 %v774_v30, %v453_v19 }
 0x27b   :  { %v469_v35 = vmul.f32 %v468_v29, %v464_v31 }
 0x27d   :  { %v474_v38 = vadd.f32 %v473_v34, %v469_v35 }
 0x27f   :  { %v614_v40 = vmul.f32 %v474_v38, %v474_v38  ;;  %v492_v41 = vpack.c.bf16 %v474_v38, %v474_v38 }
 0x281   :  { %615 = vadd.xlane.f32.xlu1 %v614_v40  ;;  %606 = vmatmul.mubr.bf16.vlgmr.msra.gmra.mxu0 %v492_v41 }
 0x30a   :  { %v616_v44 = vpop.xlane.xlu1 %615 }
 0x30b   :  { %v621_v45 = vmul.f32 %v620_v43, %v616_v44 }
 0x30d   :  { %v626_v47 = vadd.f32 %v625_v32, %v621_v45 }
 0x341   :  { %v607_v46 = vpop.f32.mrf.mxu0 }
 0x343   :  { %v609_v36 = vpop.f32.mrf.mxu0 }
 0x344   :  { %v627_v33 = vadd.f32 %v626_v47, %v609_v36 }
 0x345   :  { %v611_v48 = vpop.f32.mrf.mxu0 }
 0x346   :  { %v628_v49 = vmin.f32 %v627_v33, 0.0 }
 0x347   :  { %v612_v50 = vpop.f32.mrf.mxu0 }
 0x348   :  { %v629_v51 = vmul.f32 1.442695, %v628_v49 }
 0x34a   :  { %775 = vpow2.f32 %v629_v51 }
 0x357   :  { %v776_v52 = vpop.eup %775 }
 0x358   :  { %v631_v53 = vmul.f32 %v776_v52, %v607_v46 }
 0x35a   :  { %632 = vst [vmem:[%s956_s8] sm:$0xff] %v631_v53 }
 0x35b   :  { %637 = vsyncpa [#allocation3], 1 }
 0x35c   :  { %638 = vsyncpa [#allocation5], 1 }

</bundles_post_ra>
